<compile_context>
chip_gen: v6e
topology: v6e:2x2x1
jax: 0.10.0
libtpu: 0.0.40
codegen_flags: <defaults>
</compile_context>

<pallas_src>
import functools

import jax
import jax.numpy as jnp
from jax.experimental import pallas as pl
from jax.experimental.pallas import tpu as pltpu


def _gap_kernel(x_ref, o_ref, acc_ref, *, hw_total, hw_tile, mask_tail):
    # x_ref:   (TR, THW) input block, native dtype
    # o_ref:   (TR, 1)   output block (resident across the HW grid axis)
    # acc_ref: (TR, 1)   f32 accumulator scratch
    k = pl.program_id(1)

    @pl.when(k == 0)
    def _():
        acc_ref[...] = jnp.zeros_like(acc_ref)

    x = x_ref[...]  # keep native width; accumulate in f32 below
    if mask_tail:
        # Zero out lanes past the true H*W extent on the ragged last HW tile.
        lane = jax.lax.broadcasted_iota(jnp.int32, x.shape, dimension=1)
        valid = (k * hw_tile + lane) < hw_total
        x = jnp.where(valid, x, jnp.zeros_like(x))

    acc_ref[...] += jnp.sum(x, axis=1, keepdims=True, dtype=jnp.float32)

    @pl.when(k == pl.num_programs(1) - 1)
    def _():
        o_ref[...] = (acc_ref[...] * (1.0 / hw_total)).astype(o_ref.dtype)


def _choose_tiles(rows, hw, itemsize):
    """Pick (row_tile, hw_tile) with each input block <= ~4 MiB.

    Legality: a tile equals the full dim, or row_tile % 128 == 0 (satisfies
    both the input sublane and the output lane constraint) and
    hw_tile % 128 == 0.
    """
    budget = 4 * 1024 * 1024  # per input block; the pipeline double-buffers it

    # Case 1: the whole (rows, hw) slab fits -> single block, single DMA.
    if rows * hw * itemsize <= budget:
        return rows, hw

    # Case 2: full-HW rows fit with a decent row count -> tile rows only.
    rows_at_full_hw = budget // (hw * itemsize)
    if rows_at_full_hw >= 128:
        tr = min(512, (rows_at_full_hw // 128) * 128)
        tr = rows if rows <= tr else tr
        return tr, hw

    # Case 3: HW itself is large -> tile HW too (masked ragged tail).
    tr = rows if rows <= 256 else 256
    thw = max(128, (budget // (tr * itemsize)) // 128 * 128)
    return tr, thw


def global_avg_pool2d(x, squeeze=True, *, row_tile=None, hw_tile=None):
    """Pallas implementation of lightnet GlobalAvgPool2d.forward."""
    B, C, H, W = x.shape
    R, HW = B * C, H * W
    x2 = x.reshape(R, HW)  # free reshape: rows = (batch, channel), lanes = H*W

    tr_auto, thw_auto = _choose_tiles(R, HW, x.dtype.itemsize)
    tr = row_tile if row_tile is not None else tr_auto
    thw = hw_tile if hw_tile is not None else thw_auto

    n_r = pl.cdiv(R, tr)
    n_hw = pl.cdiv(HW, thw)
    mask_tail = (HW % thw) != 0

    kernel = functools.partial(
        _gap_kernel, hw_total=HW, hw_tile=thw, mask_tail=mask_tail
    )

    out = pl.pallas_call(
        kernel,
        out_shape=jax.ShapeDtypeStruct((R, 1), x.dtype),
        grid=(n_r, n_hw),
        in_specs=[
            pl.BlockSpec((tr, thw), lambda r, k: (r, k)),
        ],
        # Output block index ignores k -> resident target across the HW axis;
        # the store happens once per row-tile, at the last HW step.
        out_specs=pl.BlockSpec((tr, 1), lambda r, k: (r, 0)),
        scratch_shapes=[pltpu.VMEM((tr, 1), jnp.float32)],
        compiler_params=pltpu.CompilerParams(
            dimension_semantics=("parallel", "arbitrary"),
            vmem_limit_bytes=32 * 1024 * 1024,
        ),
    )(x2)

    out = out.reshape(B, C)
    if squeeze:
        return out                    # (B, C) — matches x.view(B, C)
    return out.reshape(B, C, 1, 1)    # matches F.avg_pool2d output shape


def _reference(x, squeeze=True):
    out = jnp.mean(x, axis=(2, 3))
    return out if squeeze else out.reshape(x.shape[0], x.shape[1], 1, 1)


if __name__ == "__main__":
    k0, k1, k2, k3 = jax.random.split(jax.random.PRNGKey(0), 4)

    # Small shape consistent with the module (single-block fast path).
    B, C, H, W = 2, 4, 16, 16
    x = jax.random.normal(k0, (B, C, H, W), dtype=jnp.float32)

    y = jax.block_until_ready(global_avg_pool2d(x, squeeze=True))
    assert y.shape == (B, C)
    assert jnp.allclose(y, _reference(x, squeeze=True), atol=1e-5, rtol=1e-5)

    y2 = jax.block_until_ready(global_avg_pool2d(x, squeeze=False))
    assert y2.shape == (B, C, 1, 1)
    assert jnp.allclose(y2, _reference(x, squeeze=False), atol=1e-5, rtol=1e-5)

    # Multi-HW-tile accumulation with a masked ragged tail
    # (HW = 320, tile = 128 -> 3 tiles, last one partially valid).
    xb = jax.random.normal(k1, (2, 12, 16, 20), dtype=jnp.float32)
    yb = jax.block_until_ready(global_avg_pool2d(xb, squeeze=True, hw_tile=128))
    assert jnp.allclose(yb, _reference(xb, squeeze=True), atol=1e-5, rtol=1e-5)

    # Row (batch*channel) tiling with a ragged last row tile
    # (R = 600, row_tile = 256 -> 3 tiles, last has 88 valid rows).
    xc = jax.random.normal(k2, (2, 300, 7, 7), dtype=jnp.float32)
    yc = jax.block_until_ready(global_avg_pool2d(xc, squeeze=True, row_tile=256))
    assert yc.shape == (2, 300)
    assert jnp.allclose(yc, _reference(xc, squeeze=True), atol=1e-5, rtol=1e-5)
    # Same shape through the auto single-block path.
    yc2 = jax.block_until_ready(global_avg_pool2d(xc, squeeze=True))
    assert jnp.allclose(yc2, _reference(xc, squeeze=True), atol=1e-5, rtol=1e-5)

    # bf16 input, f32 accumulation.
    xd = jax.random.normal(k3, (2, 4, 16, 16), dtype=jnp.bfloat16)
    yd = jax.block_until_ready(global_avg_pool2d(xd, squeeze=True))
    assert jnp.allclose(
        yd.astype(jnp.float32),
        _reference(xd.astype(jnp.float32), squeeze=True),
        atol=2e-2, rtol=2e-2,
    )

    print("KERNEL_OK")
</pallas_src>

<mosaic_0001>
module attributes {stable_mosaic.version = 11 : i64} {
  func.func @_gap_kernel(%arg0: i32, %arg1: i32, %arg2: memref<8x256xf32, #tpu.memory_space<vmem>>, %arg3: memref<8x1xf32, #tpu.memory_space<vmem>>, %arg4: memref<8x1xf32, #tpu.memory_space<vmem>>) attributes {dimension_semantics = [#tpu.dimension_semantics<parallel>, #tpu.dimension_semantics<arbitrary>], iteration_bounds = array<i64: 1, 1>, scalar_prefetch = 0 : i64, scratch_operands = 1 : i64, tpu.core_type = #tpu.core_type<tc>, window_params = [{transform_indices = @transform_0, window_bounds = array<i64: 8, 256>}, {transform_indices = @transform_1, window_bounds = array<i64: 8, 1>}]} {
    %c0_i32 = arith.constant 0 : i32
    %0 = arith.cmpi eq, %arg1, %c0_i32 : i32
    %1 = arith.extui %0 : i1 to i32
    %c0_i32_0 = arith.constant 0 : i32
    %2 = arith.cmpi ne, %1, %c0_i32_0 : i32
    scf.if %2 {
      %cst_8 = arith.constant 0.000000e+00 : f32
      %12 = vector.broadcast %cst_8 : f32 to vector<8x1xf32>
      %c0_9 = arith.constant 0 : index
      %c0_10 = arith.constant 0 : index
      %13 = vector.load %arg4[%c0_9, %c0_10] : memref<8x1xf32, #tpu.memory_space<vmem>>, vector<8x1xf32>
      tpu.vector_store %arg4[%c0_9, %c0_10], %12 {strides = array<i32>} : memref<8x1xf32, #tpu.memory_space<vmem>>, vector<8x1xf32>,
    } else {
    }
    %c0 = arith.constant 0 : index
    %c0_1 = arith.constant 0 : index
    %3 = vector.load %arg2[%c0, %c0_1] : memref<8x256xf32, #tpu.memory_space<vmem>>, vector<8x256xf32>
    %c0_2 = arith.constant 0 : index
    %c0_3 = arith.constant 0 : index
    %4 = vector.load %arg4[%c0_2, %c0_3] : memref<8x1xf32, #tpu.memory_space<vmem>>, vector<8x1xf32>
    %cst = arith.constant dense<0.000000e+00> : vector<8xf32>
    %5 = vector.multi_reduction <add>, %3, %cst [1] : vector<8x256xf32> to vector<8xf32>
    %6 = vector.shape_cast %5 : vector<8xf32> to vector<8x1xf32>
    %7 = arith.addf %4, %6 : vector<8x1xf32>
    %c0_4 = arith.constant 0 : index
    %c0_5 = arith.constant 0 : index
    %8 = vector.load %arg4[%c0_4, %c0_5] : memref<8x1xf32, #tpu.memory_space<vmem>>, vector<8x1xf32>
    tpu.vector_store %arg4[%c0_4, %c0_5], %7 {strides = array<i32>} : memref<8x1xf32, #tpu.memory_space<vmem>>, vector<8x1xf32>,
    %c0_i32_6 = arith.constant 0 : i32
    %9 = arith.cmpi eq, %arg1, %c0_i32_6 : i32
    %10 = arith.extui %9 : i1 to i32
    %c0_i32_7 = arith.constant 0 : i32
    %11 = arith.cmpi ne, %10, %c0_i32_7 : i32
    scf.if %11 {
      %c0_8 = arith.constant 0 : index
      %c0_9 = arith.constant 0 : index
      %12 = vector.load %arg4[%c0_8, %c0_9] : memref<8x1xf32, #tpu.memory_space<vmem>>, vector<8x1xf32>
      %cst_10 = arith.constant 3.906250e-03 : f32
      %13 = vector.broadcast %cst_10 : f32 to vector<8x1xf32>
      %14 = arith.mulf %12, %13 : vector<8x1xf32>
      %c0_11 = arith.constant 0 : index
      %c0_12 = arith.constant 0 : index
      %15 = vector.load %arg3[%c0_11, %c0_12] : memref<8x1xf32, #tpu.memory_space<vmem>>, vector<8x1xf32>
      tpu.vector_store %arg3[%c0_11, %c0_12], %14 {strides = array<i32>} : memref<8x1xf32, #tpu.memory_space<vmem>>, vector<8x1xf32>,
    } else {
    }
    return
  }
  func.func @transform_0(%arg0: i32, %arg1: i32) -> (i32, i32) {
    %c0_i32 = arith.constant 0 : i32
    return %arg0, %arg1 : i32, i32
  }
  func.func @transform_1(%arg0: i32, %arg1: i32) -> (i32, i32) {
    %c0_i32 = arith.constant 0 : i32
    %c0_i32_0 = arith.constant 0 : i32
    return %arg0, %c0_i32 : i32, i32
  }
}

</mosaic_0001>

<bundles_post_ra>
// kernel: tpu_custom_call.1
= control target key start
LH: loop header
LB: loop body
LE: loop exit
PB: predicated region body
PF: predicated region fallthrough
CT: control target
= control target key end

     0   :  { %6 = vsyncpa [#allocation4], 0  ;;  %s70_s6 = smov [#allocation3]   ;;  %s88_s0 = inlined_call_operand.hbm [shape: f32[8,256], index: 0, kind: input, shape index: {}]   ;;  %s89_s1 = inlined_call_operand.vmem [shape: f32[8,1], index: 1, kind: output, shape index: {}]  }
   0x1   :  { %s13_s7 = sshll.u32 %s70_s6, 4  ;;  %s14_s7 = int_to_ptr.vmem [resolvable:$true] %s13_s7 }
   0x2   :  { %s56_s8 = scalar_lea.vmem %s14_s7, 256  ;;  %p61_p1 = scmp.lt.s32.totalorder %s14_s7, %s14_s7 }
   0x3   :  { %p57_p0 = scmp.ne.s32.totalorder %s14_s7, %s56_s8  ;;  %p62_p2 = scmp.lt.s32.totalorder %s56_s8, %s56_s8 }
   0x5   :  { %p63_p3 = por %p62_p2, %p61_p1 }
   0x7   :  { %p64_p4 = pnand %p63_p3, %p57_p0 }
   0x9   :  { %67 = shalt.err (!%p64_p4)
}
   0xa   :  { %16 = dma.hbm_to_vmem [thread:$0]  %s88_s0, 256, %s14_s7, [#allocation4]  }
   0xb   :  { %68 = dma.done.wait [#allocation4], 256  }
   0xc   :  { %69 = vsyncadd [#allocation4], 4294967040  ;;  %vm24_vm0 = vcmask 7168   ;;  %v71_v0 = vmov 0.0   ;;  %v26_v1 = vld [vmem:[#allocation3] sm:$0xff]  ;;  %v27_v2 = vld [vmem:[#allocation3 + $0x8] sm:$0xff] }
   0xd   :  { %25 = vst.msk [vmem:[#allocation2] sm:$0xff] %vm24_vm0, %v71_v0  ;;  %v29_v3 = vadd.f32 %v27_v2, %v26_v1 }
   0xf   :  { %30 = vadd.xlane.f32.xlu0 %v29_v3 }
  0x14   :  { %v28_v4 = vld [vmem:[#allocation2] sm:$0xff] }
  0x98   :  { %v31_v5 = vpop.xlane.xlu0 %30 }
  0x99   :  { %v32_v6 = vadd.f32 %v31_v5, %v28_v4 }
  0x9b   :  { %34 = vst.msk [vmem:[#allocation2] sm:$0xff] %vm24_vm0, %v32_v6 }
  0xa2   :  { %v38_v7 = vld [vmem:[#allocation2] sm:$0xff] }
  0xa3   :  { %v39_v8 = vmul.f32 0.00390625, %v38_v7 }
  0xa5   :  { %40 = vst.msk [vmem:[%s89_s1] sm:$0xff] %vm24_vm0, %v39_v8 }
  0xa6   :  { %45 = vsyncpa [#allocation4], 1 }

</bundles_post_ra>
